<compile_context>
chip_gen: v6e
topology: v6e:2x2x1
jax: 0.10.0
libtpu: 0.0.40
codegen_flags: <defaults>
</compile_context>

<pallas_src>
import functools

import jax
import jax.numpy as jnp
from jax.experimental import pallas as pl
from jax.experimental.pallas import tpu as pltpu


def _conv3x3_kernel(w_ref, x_ref, m_ref, b_ref, o_ref, *, W):
    # w_ref: (9, Cout, Cin)        bf16  (constant index map -> stays resident in VMEM)
    # x_ref: (Cin, (TH+2)*W + 2)   bf16  row-halo slab for one (batch, row-block), flattened,
    #                                    with one zero element prepended/appended.
    # m_ref: (2, TH*W)             bf16  [0] zeroes w==0 column, [1] zeroes w==W-1 column
    # b_ref: (Cout, 1)             f32
    # o_ref: (Cout, TH*W)          f32   lane-dense output tile
    Cout, TM = o_ref.shape
    x = x_ref[...]                     # (Cin, L) bf16
    m = m_ref[...]                     # (2, TM)  bf16

    acc = jnp.zeros((Cout, TM), jnp.float32)
    for kh in range(3):                # fully unrolled: 9 taps
        for kw in range(3):
            start = kh * W + kw        # lane offset of this tap inside the padded slab
            xs = x[:, start:start + TM]            # (Cin, TM), lane shift only
            if kw == 0:
                xs = xs * m[0:1, :]                # zero contributions from w-1 < 0
            elif kw == 2:
                xs = xs * m[1:2, :]                # zero contributions from w+1 >= W
            acc = acc + jnp.dot(w_ref[kh * 3 + kw], xs,
                                preferred_element_type=jnp.float32)
    o_ref[...] = (acc + b_ref[...]).astype(o_ref.dtype)


def _pick_row_tile(B, H, W, Cin, Cout, vmem_budget_bytes=10 * 1024 * 1024):
    """Pick TH (output rows per block) so that: output tiles are lane-aligned (TH*W % 128 == 0)
    unless a single full-image block is used, per-step VMEM stays under budget (keeps the
    default scoped-VMEM limit safe on v5e/v6e/v7x), and the total grid gives >= 2 (ideally an
    even number of) steps so both TensorCores are used on v7x."""
    best = None
    for TH in range(1, H + 1):
        if H % TH:
            continue
        NB = H // TH
        TM = TH * W
        if NB > 1 and TM % 128 != 0:
            continue
        vmem = (2 * Cin * ((TH + 2) * W + 2) * 2      # double-buffered bf16 input slab
                + 2 * Cout * TM * 4                   # double-buffered f32 output tile
                + Cout * TM * 4                       # f32 accumulator value
                + 9 * Cout * Cin * 2 + Cout * 4 + 2 * TM * 2)
        if vmem > vmem_budget_bytes and NB > 1:
            continue
        steps = B * NB
        score = (1 if steps >= 2 else 0,              # use both TCs
                 1 if steps % 2 == 0 else 0,          # even split across TCs
                 1 if 512 <= TM <= 2048 else 0,       # amortize ~0.35us/step overhead
                 min(TM, 2048),                       # otherwise: biggest tile that fits
                 -vmem)
        if best is None or score > best[0]:
            best = (score, TH, NB, TM)
    if best is None:
        # TODO(synk): shapes where H has no usable divisor fall back to one block per image.
        return H, 1, H * W
    return best[1], best[2], best[3]


def upsampler_forward(x_nchw, w_oihw, bias, scale):
    """Matches PyTorch: Conv2d(nFeat, nFeat*4, 3, 1, 1) -> PixelShuffle(scale). NCHW in/out."""
    B, Cin, H, W = x_nchw.shape
    Cout = w_oihw.shape[0]
    r = scale
    C = Cout // (r * r)

    TH, NB, TM = _pick_row_tile(B, H, W, Cin, Cout)
    L = (TH + 2) * W + 2

    # ---- wrapper: bf16 FIRST, then the (small, ~(TH+2)/TH x) row-halo slabs --------------
    xb = x_nchw.astype(jnp.bfloat16)                           # (B, Cin, H, W)
    xp = jnp.pad(xb, ((0, 0), (0, 0), (1, 1), (0, 0)))         # zero-pad rows only
    row_blocks = [xp[:, :, n * TH: n * TH + TH + 2, :].reshape(B, Cin, (TH + 2) * W)
                  for n in range(NB)]
    slabs = jnp.stack(row_blocks, axis=1)                      # (B, NB, Cin, (TH+2)*W)
    slabs = jnp.pad(slabs, ((0, 0), (0, 0), (0, 0), (1, 1)))   # (B, NB, Cin, L)

    # weights: (Cout, Cin, 3, 3) -> (9, Cout, Cin), tap index t = kh*3 + kw
    w9 = jnp.transpose(w_oihw, (2, 3, 0, 1)).reshape(9, Cout, Cin).astype(jnp.bfloat16)
    b2 = bias.reshape(Cout, 1).astype(jnp.float32)

    # column-boundary masks for the kw = 0 / kw = 2 taps (depend only on w = p % W)
    col = jnp.arange(TM, dtype=jnp.int32) % W
    masks = jnp.stack([(col != 0), (col != W - 1)], axis=0).astype(jnp.bfloat16)  # (2, TM)

    grid = (B, NB)
    kernel = functools.partial(_conv3x3_kernel, W=W)

    cost = pl.CostEstimate(
        flops=2 * B * H * W * 9 * Cin * Cout,
        transcendentals=0,
        bytes_accessed=(slabs.size * 2 + w9.size * 2 + Cout * 4 + 2 * TM * 2
                        + B * Cout * H * W * 4),
    )

    y = pl.pallas_call(
        kernel,
        out_shape=jax.ShapeDtypeStruct((B, Cout, H * W), jnp.float32),
        grid_spec=pltpu.PrefetchScalarGridSpec(
            num_scalar_prefetch=0,
            grid=grid,
            in_specs=[
                pl.BlockSpec((9, Cout, Cin), lambda b, n: (0, 0, 0)),      # resident weights
                pl.BlockSpec((None, None, Cin, L), lambda b, n: (b, n, 0, 0)),
                pl.BlockSpec((2, TM), lambda b, n: (0, 0)),                # column masks
                pl.BlockSpec((Cout, 1), lambda b, n: (0, 0)),              # bias
            ],
            out_specs=pl.BlockSpec((None, Cout, TM), lambda b, n: (b, 0, n)),
        ),
        compiler_params=pltpu.CompilerParams(
            dimension_semantics=("parallel", "parallel")),
        cost_estimate=cost,
    )(w9, slabs, masks, b2)                                    # (B, Cout, H*W) f32

    # ---- pixel-shuffle epilogue (single XLA transpose pass; see TODO at top) -------------
    y = y.reshape(B, C, r, r, H, W)
    y = jnp.transpose(y, (0, 1, 4, 2, 5, 3))                   # (B, C, H, r, W, r)
    return y.reshape(B, C, H * r, W * r)


def reference_forward(x_nchw, w_oihw, bias, scale):
    """Pure-JAX reference (XLA conv, f32) for correctness checking."""
    y = jax.lax.conv_general_dilated(
        x_nchw, w_oihw, window_strides=(1, 1), padding=((1, 1), (1, 1)),
        dimension_numbers=("NCHW", "OIHW", "NCHW"))
    y = y + bias.reshape(1, -1, 1, 1)
    B, CR2, H, W = y.shape
    r = scale
    C = CR2 // (r * r)
    y = y.reshape(B, C, r, r, H, W)
    y = jnp.transpose(y, (0, 1, 4, 2, 5, 3))
    return y.reshape(B, C, H * r, W * r)


if __name__ == "__main__":
    # Small shapes consistent with the module: scale=2, nFeat=4, 16x16 spatial, batch=2.
    scale = 2
    nFeat = 4
    B, H, W = 2, 16, 16

    key = jax.random.PRNGKey(0)
    kx, kw, kb = jax.random.split(key, 3)
    x = jax.random.normal(kx, (B, nFeat, H, W), dtype=jnp.float32)                 # NCHW
    w = jax.random.normal(kw, (nFeat * 4, nFeat, 3, 3), dtype=jnp.float32) * 0.1   # OIHW
    b = jax.random.normal(kb, (nFeat * 4,), dtype=jnp.float32) * 0.1

    out = upsampler_forward(x, w, b, scale)
    out = jax.block_until_ready(out)

    ref = reference_forward(x, w, b, scale)
    assert out.shape == (B, nFeat * 4 // (scale * scale), H * scale, W * scale)
    # bf16 MXU inputs with f32 accumulation -> loosened tolerance vs the f32 XLA reference.
    assert jnp.allclose(out, ref, atol=5e-2, rtol=5e-2), "mismatch vs XLA reference"

    print("KERNEL_OK")
</pallas_src>

<mosaic_0001>
module attributes {stable_mosaic.version = 11 : i64} {
  func.func @_conv3x3_kernel(%arg0: i32, %arg1: i32, %arg2: memref<9x16x4xbf16, #tpu.memory_space<vmem>>, %arg3: memref<1x1x4x290xbf16, #tpu.memory_space<vmem>>, %arg4: memref<2x256xbf16, #tpu.memory_space<vmem>>, %arg5: memref<16x1xf32, #tpu.memory_space<vmem>>, %arg6: memref<1x16x256xf32, #tpu.memory_space<vmem>>) attributes {dimension_semantics = [#tpu.dimension_semantics<parallel>, #tpu.dimension_semantics<parallel>], iteration_bounds = array<i64: 2, 1>, scalar_prefetch = 0 : i64, scratch_operands = 0 : i64, tpu.core_type = #tpu.core_type<tc>, window_params = [{pipeline_mode = #tpu.pipeline_mode<synchronous>, transform_indices = @transform_0, window_bounds = array<i64: 9, 16, 4>}, {transform_indices = @transform_1, window_bounds = array<i64: 1, 1, 4, 290>}, {pipeline_mode = #tpu.pipeline_mode<synchronous>, transform_indices = @transform_2, window_bounds = array<i64: 2, 256>}, {pipeline_mode = #tpu.pipeline_mode<synchronous>, transform_indices = @transform_3, window_bounds = array<i64: 16, 1>}, {transform_indices = @transform_4, window_bounds = array<i64: 1, 16, 256>}]} {
    %c0 = arith.constant 0 : index
    %c0_0 = arith.constant 0 : index
    %c0_1 = arith.constant 0 : index
    %c0_2 = arith.constant 0 : index
    %0 = vector.load %arg3[%c0, %c0_0, %c0_1, %c0_2] : memref<1x1x4x290xbf16, #tpu.memory_space<vmem>>, vector<1x1x4x290xbf16>
    %1 = vector.shape_cast %0 : vector<1x1x4x290xbf16> to vector<4x290xbf16>
    %c0_3 = arith.constant 0 : index
    %c0_4 = arith.constant 0 : index
    %2 = vector.load %arg4[%c0_3, %c0_4] : memref<2x256xbf16, #tpu.memory_space<vmem>>, vector<2x256xbf16>
    %cst = arith.constant 0.000000e+00 : f32
    %3 = vector.broadcast %cst : f32 to vector<16x256xf32>
    %4 = vector.extract_strided_slice %1 {offsets = [0, 0], sizes = [4, 256], strides = [1, 1]} : vector<4x290xbf16> to vector<4x256xbf16>
    %5 = vector.extract_strided_slice %2 {offsets = [0, 0], sizes = [1, 256], strides = [1, 1]} : vector<2x256xbf16> to vector<1x256xbf16>
    %6 = vector.broadcast %5 : vector<1x256xbf16> to vector<4x256xbf16>
    %7 = arith.mulf %4, %6 : vector<4x256xbf16>
    %c0_5 = arith.constant 0 : index
    %c0_6 = arith.constant 0 : index
    %c0_7 = arith.constant 0 : index
    %8 = vector.load %arg2[%c0_5, %c0_6, %c0_7] : memref<9x16x4xbf16, #tpu.memory_space<vmem>>, vector<1x16x4xbf16>
    %9 = vector.shape_cast %8 : vector<1x16x4xbf16> to vector<16x4xbf16>
    %cst_8 = arith.constant dense<0.000000e+00> : vector<16x256xf32>
    %10 = tpu.matmul %9, %7, %cst_8 {dimension_numbers = #tpu.dot_dimension_numbers<[1], [0], [0], [1], [0, 0, 1, 1], [], []>} : vector<16x4xbf16>, vector<4x256xbf16>, vector<16x256xf32> -> vector<16x256xf32>
    %11 = arith.addf %3, %10 : vector<16x256xf32>
    %12 = vector.extract_strided_slice %1 {offsets = [0, 1], sizes = [4, 256], strides = [1, 1]} : vector<4x290xbf16> to vector<4x256xbf16>
    %c1 = arith.constant 1 : index
    %c0_9 = arith.constant 0 : index
    %c0_10 = arith.constant 0 : index
    %13 = vector.load %arg2[%c1, %c0_9, %c0_10] : memref<9x16x4xbf16, #tpu.memory_space<vmem>>, vector<1x16x4xbf16>
    %14 = vector.shape_cast %13 : vector<1x16x4xbf16> to vector<16x4xbf16>
    %cst_11 = arith.constant dense<0.000000e+00> : vector<16x256xf32>
    %15 = tpu.matmul %14, %12, %cst_11 {dimension_numbers = #tpu.dot_dimension_numbers<[1], [0], [0], [1], [0, 0, 1, 1], [], []>} : vector<16x4xbf16>, vector<4x256xbf16>, vector<16x256xf32> -> vector<16x256xf32>
    %16 = arith.addf %11, %15 : vector<16x256xf32>
    %17 = vector.extract_strided_slice %1 {offsets = [0, 2], sizes = [4, 256], strides = [1, 1]} : vector<4x290xbf16> to vector<4x256xbf16>
    %18 = vector.extract_strided_slice %2 {offsets = [1, 0], sizes = [1, 256], strides = [1, 1]} : vector<2x256xbf16> to vector<1x256xbf16>
    %19 = vector.broadcast %18 : vector<1x256xbf16> to vector<4x256xbf16>
    %20 = arith.mulf %17, %19 : vector<4x256xbf16>
    %c2 = arith.constant 2 : index
    %c0_12 = arith.constant 0 : index
    %c0_13 = arith.constant 0 : index
    %21 = vector.load %arg2[%c2, %c0_12, %c0_13] : memref<9x16x4xbf16, #tpu.memory_space<vmem>>, vector<1x16x4xbf16>
    %22 = vector.shape_cast %21 : vector<1x16x4xbf16> to vector<16x4xbf16>
    %cst_14 = arith.constant dense<0.000000e+00> : vector<16x256xf32>
    %23 = tpu.matmul %22, %20, %cst_14 {dimension_numbers = #tpu.dot_dimension_numbers<[1], [0], [0], [1], [0, 0, 1, 1], [], []>} : vector<16x4xbf16>, vector<4x256xbf16>, vector<16x256xf32> -> vector<16x256xf32>
    %24 = arith.addf %16, %23 : vector<16x256xf32>
    %25 = vector.extract_strided_slice %1 {offsets = [0, 16], sizes = [4, 256], strides = [1, 1]} : vector<4x290xbf16> to vector<4x256xbf16>
    %26 = vector.extract_strided_slice %2 {offsets = [0, 0], sizes = [1, 256], strides = [1, 1]} : vector<2x256xbf16> to vector<1x256xbf16>
    %27 = vector.broadcast %26 : vector<1x256xbf16> to vector<4x256xbf16>
    %28 = arith.mulf %25, %27 : vector<4x256xbf16>
    %c3 = arith.constant 3 : index
    %c0_15 = arith.constant 0 : index
    %c0_16 = arith.constant 0 : index
    %29 = vector.load %arg2[%c3, %c0_15, %c0_16] : memref<9x16x4xbf16, #tpu.memory_space<vmem>>, vector<1x16x4xbf16>
    %30 = vector.shape_cast %29 : vector<1x16x4xbf16> to vector<16x4xbf16>
    %cst_17 = arith.constant dense<0.000000e+00> : vector<16x256xf32>
    %31 = tpu.matmul %30, %28, %cst_17 {dimension_numbers = #tpu.dot_dimension_numbers<[1], [0], [0], [1], [0, 0, 1, 1], [], []>} : vector<16x4xbf16>, vector<4x256xbf16>, vector<16x256xf32> -> vector<16x256xf32>
    %32 = arith.addf %24, %31 : vector<16x256xf32>
    %33 = vector.extract_strided_slice %1 {offsets = [0, 17], sizes = [4, 256], strides = [1, 1]} : vector<4x290xbf16> to vector<4x256xbf16>
    %c4 = arith.constant 4 : index
    %c0_18 = arith.constant 0 : index
    %c0_19 = arith.constant 0 : index
    %34 = vector.load %arg2[%c4, %c0_18, %c0_19] : memref<9x16x4xbf16, #tpu.memory_space<vmem>>, vector<1x16x4xbf16>
    %35 = vector.shape_cast %34 : vector<1x16x4xbf16> to vector<16x4xbf16>
    %cst_20 = arith.constant dense<0.000000e+00> : vector<16x256xf32>
    %36 = tpu.matmul %35, %33, %cst_20 {dimension_numbers = #tpu.dot_dimension_numbers<[1], [0], [0], [1], [0, 0, 1, 1], [], []>} : vector<16x4xbf16>, vector<4x256xbf16>, vector<16x256xf32> -> vector<16x256xf32>
    %37 = arith.addf %32, %36 : vector<16x256xf32>
    %38 = vector.extract_strided_slice %1 {offsets = [0, 18], sizes = [4, 256], strides = [1, 1]} : vector<4x290xbf16> to vector<4x256xbf16>
    %39 = vector.extract_strided_slice %2 {offsets = [1, 0], sizes = [1, 256], strides = [1, 1]} : vector<2x256xbf16> to vector<1x256xbf16>
    %40 = vector.broadcast %39 : vector<1x256xbf16> to vector<4x256xbf16>
    %41 = arith.mulf %38, %40 : vector<4x256xbf16>
    %c5 = arith.constant 5 : index
    %c0_21 = arith.constant 0 : index
    %c0_22 = arith.constant 0 : index
    %42 = vector.load %arg2[%c5, %c0_21, %c0_22] : memref<9x16x4xbf16, #tpu.memory_space<vmem>>, vector<1x16x4xbf16>
    %43 = vector.shape_cast %42 : vector<1x16x4xbf16> to vector<16x4xbf16>
    %cst_23 = arith.constant dense<0.000000e+00> : vector<16x256xf32>
    %44 = tpu.matmul %43, %41, %cst_23 {dimension_numbers = #tpu.dot_dimension_numbers<[1], [0], [0], [1], [0, 0, 1, 1], [], []>} : vector<16x4xbf16>, vector<4x256xbf16>, vector<16x256xf32> -> vector<16x256xf32>
    %45 = arith.addf %37, %44 : vector<16x256xf32>
    %46 = vector.extract_strided_slice %1 {offsets = [0, 32], sizes = [4, 256], strides = [1, 1]} : vector<4x290xbf16> to vector<4x256xbf16>
    %47 = vector.extract_strided_slice %2 {offsets = [0, 0], sizes = [1, 256], strides = [1, 1]} : vector<2x256xbf16> to vector<1x256xbf16>
    %48 = vector.broadcast %47 : vector<1x256xbf16> to vector<4x256xbf16>
    %49 = arith.mulf %46, %48 : vector<4x256xbf16>
    %c6 = arith.constant 6 : index
    %c0_24 = arith.constant 0 : index
    %c0_25 = arith.constant 0 : index
    %50 = vector.load %arg2[%c6, %c0_24, %c0_25] : memref<9x16x4xbf16, #tpu.memory_space<vmem>>, vector<1x16x4xbf16>
    %51 = vector.shape_cast %50 : vector<1x16x4xbf16> to vector<16x4xbf16>
    %cst_26 = arith.constant dense<0.000000e+00> : vector<16x256xf32>
    %52 = tpu.matmul %51, %49, %cst_26 {dimension_numbers = #tpu.dot_dimension_numbers<[1], [0], [0], [1], [0, 0, 1, 1], [], []>} : vector<16x4xbf16>, vector<4x256xbf16>, vector<16x256xf32> -> vector<16x256xf32>
    %53 = arith.addf %45, %52 : vector<16x256xf32>
    %54 = vector.extract_strided_slice %1 {offsets = [0, 33], sizes = [4, 256], strides = [1, 1]} : vector<4x290xbf16> to vector<4x256xbf16>
    %c7 = arith.constant 7 : index
    %c0_27 = arith.constant 0 : index
    %c0_28 = arith.constant 0 : index
    %55 = vector.load %arg2[%c7, %c0_27, %c0_28] : memref<9x16x4xbf16, #tpu.memory_space<vmem>>, vector<1x16x4xbf16>
    %56 = vector.shape_cast %55 : vector<1x16x4xbf16> to vector<16x4xbf16>
    %cst_29 = arith.constant dense<0.000000e+00> : vector<16x256xf32>
    %57 = tpu.matmul %56, %54, %cst_29 {dimension_numbers = #tpu.dot_dimension_numbers<[1], [0], [0], [1], [0, 0, 1, 1], [], []>} : vector<16x4xbf16>, vector<4x256xbf16>, vector<16x256xf32> -> vector<16x256xf32>
    %58 = arith.addf %53, %57 : vector<16x256xf32>
    %59 = vector.extract_strided_slice %1 {offsets = [0, 34], sizes = [4, 256], strides = [1, 1]} : vector<4x290xbf16> to vector<4x256xbf16>
    %60 = vector.extract_strided_slice %2 {offsets = [1, 0], sizes = [1, 256], strides = [1, 1]} : vector<2x256xbf16> to vector<1x256xbf16>
    %61 = vector.broadcast %60 : vector<1x256xbf16> to vector<4x256xbf16>
    %62 = arith.mulf %59, %61 : vector<4x256xbf16>
    %c8 = arith.constant 8 : index
    %c0_30 = arith.constant 0 : index
    %c0_31 = arith.constant 0 : index
    %63 = vector.load %arg2[%c8, %c0_30, %c0_31] : memref<9x16x4xbf16, #tpu.memory_space<vmem>>, vector<1x16x4xbf16>
    %64 = vector.shape_cast %63 : vector<1x16x4xbf16> to vector<16x4xbf16>
    %cst_32 = arith.constant dense<0.000000e+00> : vector<16x256xf32>
    %65 = tpu.matmul %64, %62, %cst_32 {dimension_numbers = #tpu.dot_dimension_numbers<[1], [0], [0], [1], [0, 0, 1, 1], [], []>} : vector<16x4xbf16>, vector<4x256xbf16>, vector<16x256xf32> -> vector<16x256xf32>
    %66 = arith.addf %58, %65 : vector<16x256xf32>
    %c0_33 = arith.constant 0 : index
    %c0_34 = arith.constant 0 : index
    %67 = vector.load %arg5[%c0_33, %c0_34] : memref<16x1xf32, #tpu.memory_space<vmem>>, vector<16x1xf32>
    %68 = vector.broadcast %67 : vector<16x1xf32> to vector<16x256xf32>
    %69 = arith.addf %66, %68 : vector<16x256xf32>
    %c0_35 = arith.constant 0 : index
    %c0_36 = arith.constant 0 : index
    %c0_37 = arith.constant 0 : index
    %70 = vector.load %arg6[%c0_35, %c0_36, %c0_37] : memref<1x16x256xf32, #tpu.memory_space<vmem>>, vector<1x16x256xf32>
    %71 = vector.shape_cast %70 : vector<1x16x256xf32> to vector<16x256xf32>
    %72 = vector.shape_cast %69 : vector<16x256xf32> to vector<1x16x256xf32>
    tpu.vector_store %arg6[%c0_35, %c0_36, %c0_37], %72 {strides = array<i32>} : memref<1x16x256xf32, #tpu.memory_space<vmem>>, vector<1x16x256xf32>,
    return
  }
  func.func @transform_0(%arg0: i32, %arg1: i32) -> (i32, i32, i32) {
    %c0_i32 = arith.constant 0 : i32
    %c0_i32_0 = arith.constant 0 : i32
    %c0_i32_1 = arith.constant 0 : i32
    %c0_i32_2 = arith.constant 0 : i32
    return %c0_i32, %c0_i32_0, %c0_i32_1 : i32, i32, i32
  }
  func.func @transform_1(%arg0: i32, %arg1: i32) -> (i32, i32, i32, i32) {
    %c0_i32 = arith.constant 0 : i32
    %c0_i32_0 = arith.constant 0 : i32
    %c0_i32_1 = arith.constant 0 : i32
    return %arg0, %arg1, %c0_i32, %c0_i32_0 : i32, i32, i32, i32
  }
  func.func @transform_2(%arg0: i32, %arg1: i32) -> (i32, i32) {
    %c0_i32 = arith.constant 0 : i32
    %c0_i32_0 = arith.constant 0 : i32
    %c0_i32_1 = arith.constant 0 : i32
    return %c0_i32, %c0_i32_0 : i32, i32
  }
  func.func @transform_3(%arg0: i32, %arg1: i32) -> (i32, i32) {
    %c0_i32 = arith.constant 0 : i32
    %c0_i32_0 = arith.constant 0 : i32
    %c0_i32_1 = arith.constant 0 : i32
    return %c0_i32, %c0_i32_0 : i32, i32
  }
  func.func @transform_4(%arg0: i32, %arg1: i32) -> (i32, i32, i32) {
    %c0_i32 = arith.constant 0 : i32
    %c0_i32_0 = arith.constant 0 : i32
    return %arg0, %c0_i32, %arg1 : i32, i32, i32
  }
}

</mosaic_0001>

<bundles_post_ra>
// kernel: tpu_custom_call.1
= control target key start
LH: loop header
LB: loop body
LE: loop exit
PB: predicated region body
PF: predicated region fallthrough
CT: control target
= control target key end

     0   :  { %9 = vsyncpa [#allocation3], 0  ;;  %s1711_s0 = inlined_call_operand.vmem [shape: bf16[9,16,4], index: 0, kind: input, shape index: {}]   ;;  %s1712_s1 = inlined_call_operand.vmem [shape: bf16[2,1,4,290], index: 1, kind: input, shape index: {}]   ;;  %s1713_s2 = inlined_call_operand.vmem [shape: bf16[2,256], index: 2, kind: input, shape index: {}]   ;;  %s1714_s3 = inlined_call_operand.vmem [shape: f32[16,1], index: 3, kind: input, shape index: {}]   ;;  %s1715_s4 = inlined_call_operand.hbm [shape: f32[2,16,256], index: 4, kind: output, shape index: {}]  }
   0x1   :  { %11 = vsyncpa [#allocation3 + $0x1], 0  ;;  %s1469_s15 = smov 0   ;;  %s1471_s16 = smov 0  }
   0x2   :  { %s1473_s17 = smov 0   ;;  %s1475_s18 = smov 0  }
   0x3   :  { %s1477_s19 = smov 0   ;;  %s1479_s20 = smov 0  }
   0x4 LB: > { %s1206_s21 = sadd.s32 4294967295, %s1424_s20   ;;  %s1207_s22 = sadd.s32 4294967294, %s1424_s20   ;;  %s1424_s20 = sphi %s1479_s20, %s17_s20   ;;  %s1420_s19 = sphi %s1477_s19, %s1722_s19   ;;  %s1416_s18 = sphi %s1475_s18, %s1721_s18   ;;  %s1412_s17 = sphi %s1473_s17, %s1720_s17   ;;  %s1408_s16 = sphi %s1471_s16, %s1719_s16   ;;  %s1404_s15 = sphi %s1469_s15, %s1718_s15  }
   0x5   : > { %s29_s23 = sadd.s32 1, %s1420_s19  ;;  %s129_s24 = sadd.s32 1, %s1412_s17 }
   0x6   : > { %p31_p0 = scmp.ge.s32.totalorder %s29_s23, 2  ;;  %p139_p1 = scmp.ne.s32.totalorder %s1412_s17, %s1408_s16 }
   0x7   : > { %p140_p2 = scmp.eq.s32.totalorder %s1206_s21, 1  ;;  %p145_p3 = scmp.ne.s32.totalorder %s1408_s16, %s1404_s15 }
   0x8   : > { %s1724_s23 = smov (%p31_p0, %s29_s23), 0  ;;  %p146_p5 = scmp.eq.s32.totalorder %s1207_s22, 1 }
   0x9   : > { %p1509_p4 = por %p140_p2, %p139_p1  ;;  %s124_s26 = ssub.s32 %s1420_s19, %s1724_s23 }
   0xa   : > { %p1210_p6 = scmp.ge.s32.totalorder %s1424_s20, 1  ;;  %p127_p7 = scmp.eq.s32.totalorder %s124_s26, 0 }
   0xb   : > { %p1516_p8 = por %p146_p5, %p145_p3  ;;  %p185_p9 = scmp.lt.s32.totalorder %s1424_s20, 3 }
   0xc   : > { %s1522_s28 = scalar_select %p127_p7, %s1412_s17, %s129_s24  }
   0xd   : > { %p186_p10 = pnand %p1210_p6, %p185_p9 }
   0xe   : > { %p215_p11 = scmp.lt.s32.totalorder (!%p186_p10), %s1416_s18, 1  ;;  %s1428_s10 = smov (!%p186_p10), 2  }
   0xf   : > { %189 = sbr.rel (%p186_p10) target bundleno = 534 (0x216), region = 36  ;;  %s1429_s11 = smov (!%p186_p10), 18  }
  0x10   : > { %s1430_s12 = smov (!%p186_p10), 16   ;;  %s1431_s13 = smov (!%p186_p10), 32  }
  0x11   : > { %s1432_s14 = smov (!%p186_p10), 34   ;;  %s1433_s21 = smov (!%p186_p10), 127  }
  0x12   : > { %s1434_s22 = smov (!%p186_p10), 111   ;;  %s1436_s29 = smov (!%p186_p10), 126  }
  0x13   : > { %s1437_s30 = smov (!%p186_p10), 112   ;;  %s1438_s7 = smov (!%p186_p10), 96  }
  0x14   : > { %v1213_v0 = vld.sshfl [vmem:[%s1713_s2] sm:$0x11 pattern:$0x75316420]  ;;  %v240_v1 = vlaneseq  ;;  %v1426_v2 = vmov 1966171168  }
  0x15   : > { %v238_v3 = vunpack.c.l.s4 %v1426_v2  ;;  %v236_v5 = vcombine.high %v1213_v0, %v1213_v0  ;;  %v1427_v7 = vmov 1983009808   ;;  %s216_s5 = scalar_select %p215_p11, %s1416_s18, 1  ;;  %vm317_vm0 = vcmask 1041408   ;;  %v1340_v38 = vld [vmem:[%s1711_s0] sm:$0xff]  }
  0x16   : > { %v241_v4 = vshrl.u32 %v240_v1, 7  ;;  %v269_v8 = vunpack.c.l.s4 %v1427_v7  ;;  %v1435_v39 = vmov 0   ;;  %vm313_vm1 = vcmask 31744   ;;  %s1439_s8 = smov 110  }
  0x17   : > { %v239_v6 = vunpack.c.0.s8 %v238_v3  ;;  %s1263_s6 = smul.u32 6, %s216_s5  ;;  %356 = vmatprep.mubr.bf16.mxu0 %v1435_v39  ;;  %422 = vmatprep.mubr.bf16.mxu1 %v1435_v39  ;;  %vm460_vm2 = vcmask 15360   ;;  %vm557_vm3 = vcmask 130048   ;;  %vm824_vm4 = vcmask 261120   ;;  %v1339_v3 = vld [vmem:[%s1711_s0 + $0x8] sm:$0xff]  }
  0x18   : > { %v256_v12 = vsub.s32 0, %v241_v4  ;;  %v270_v13 = vunpack.c.0.s8 %v269_v8  ;;  %1336 = vset.pattern.permute.xlu1 %v1435_v39  ;;  %1337 = vset.pattern.permute.xlu0 %v1435_v39  ;;  %vm310_vm5 = vcmask 1039360   ;;  %vm727_vm6 = vcmask 146432  }
  0x19   : > { %v242_v9 = vsub.s32 %v239_v6, %v241_v4  ;;  %s223_s9 = scalar_lea.vmem %s1712_s1, %s1263_s6  ;;  %vm994_vm7 = vcmask 277504   ;;  %vm592_vm8 = vcmask 916480   ;;  %vm495_vm9 = vcmask 1031168  }
  0x1a   : > { %v1529_v22 = vsub.s32 %v270_v13, %v241_v4  ;;  %v1536_v29 = vld [vmem:[%s223_s9] sm:$0x3f]  ;;  %s1440_s9 = smov 95   ;;  %vm665_vm10 = vcmask 908288   ;;  %vm859_vm11 = vcmask 785408   ;;  %vm762_vm12 = vcmask 900096  }
  0x1b   : > { %v243_v10 = vrot.slane %v1213_v0, %v242_v9  ;;  %v250_v11 = vrot.slane %v236_v5, %v242_v9  ;;  %v288_v31 = vcombine.high %v1536_v29, %v1536_v29  ;;  %vm932_vm13 = vcmask 777216  }
  0x1c   : > { %v1541_v30 = vrot.slane %v1536_v29, %v1529_v22  ;;  %vm1029_vm14 = vcmask 769024  }
  0x1d   : > { %v433_v14 = vshrl.u32 %v243_v10, 16  ;;  %v440_v15 = vshrl.u32 %v250_v11, 16  ;;  %v252_v16 = vpack.i.b16 %v243_v10, %v243_v10  ;;  %v259_v17 = vpack.i.b16 %v250_v11, %v250_v11 }
  0x1e   : > { %v1548_v32 = vcombine.high %v1541_v30, %v1541_v30  ;;  %v1551_v33 = vrot.slane %v288_v31, %v1529_v22 }
  0x1f   : > { %v434_v18 = vpack.i.b16 %v433_v14, %v433_v14  ;;  %v441_v19 = vpack.i.b16 %v440_v15, %v440_v15  ;;  %v257_v20 = vrot.slane %v252_v16, %v256_v12  ;;  %v264_v21 = vrot.slane %v259_v17, %v256_v12 }
  0x21   : > { %v439_v23 = vrot.slane %v434_v18, %v256_v12  ;;  %v446_v24 = vrot.slane %v441_v19, %v256_v12  ;;  %v267_v26 = vcombine.low %v257_v20, %v264_v21 }
  0x23   : > { %v449_v25 = vcombine.low %v439_v23, %v446_v24  ;;  %v274_v28 = vrot.slane %v267_v26, %v1529_v22  ;;  %v1089_v24 = vld [vmem:[%s1714_s3 + $0x8] sm:$0xff] }
  0x25   : > { %v456_v27 = vrot.slane %v449_v25, %v1529_v22  ;;  %v276_v34 = vmul.bf16 %v274_v28, %v1536_v29  ;;  %v1088_v25 = vld [vmem:[%s1714_s3] sm:$0xff] }
  0x27   : > { %457 = vrot.lane.b32.xlu0 %v456_v27, %s1428_s10  ;;  %724 = vrot.lane.b32.xlu1 %v456_v27, %s1429_s11  ;;  %v379_v35 = vrot.slane %v276_v34, %v1529_v22  ;;  %s1441_s10 = smov 94  }
  0x29   : > { %v380_v36 = vcombine.high %v379_v35, %v379_v35  ;;  %v385_v37 = vsel %vm317_vm0, %v379_v35, 0 }
  0x2b   : > { %554 = vrot.lane.b32.xlu0 %v274_v28, %s1430_s12  ;;  %821 = vrot.lane.b32.xlu1 %v274_v28, %s1431_s13 }
  0x2c   : > { %1220 = vmatprep.subr.msk.bf16.mxu1 %vm317_vm0, %v380_v36  ;;  %v1342_v36 = vld [vmem:[%s1711_s0 + $0x18] sm:$0xff]  }
  0x2d   : > { %405 = vmatpush1.bf16.msra.mxu1 %v385_v37 }
  0x2f   : > { %991 = vrot.lane.b32.xlu0 %v456_v27, %s1432_s14  ;;  %304 = vrot.lane.b32.xlu1 %v1541_v30, %s1433_s21 }
  0x30   : > { %1221 = vmatmul.mubr.msk.bf16.vlgmr.msra.gmra.mxu1 %vm313_vm1, %v1340_v38 }
  0x31   : > { %636 = vmatprep.mubr.bf16.mxu1 %v1435_v39 }
  0x33   : > { %306 = vrot.lane.b32.xlu0 %v1548_v32, %s1433_s21  ;;  %308 = vrot.lane.b32.xlu1 %v1551_v33, %s1433_s21  ;;  %s212_s21 = sand.u32 1, %s1408_s16  }
  0x37   : > { %659 = vrot.lane.b32.xlu0 %v1541_v30, %s1434_s22  ;;  %661 = vrot.lane.b32.xlu1 %v1548_v32, %s1434_s22 }
  0x3b   : > { %663 = vrot.lane.b32.xlu0 %v1551_v33, %s1434_s22  ;;  %s1211_s22 = sshll.u32 %s212_s21, 5 }
  0x3c   : > { %s214_s24 = scalar_lea.vmem [#allocation2], %s1211_s22 }
  0x3d   : > { %s1124_s26 = sshll.u32 %s214_s24, 4  ;;  %s1656_s26 = int_to_ptr.vmem [resolvable:$true] %s1124_s26 }
  0x99   : > { %v458_v40 = vpop.permute.xlu0 %457  ;;  %v725_v41 = vpop.permute.xlu1 %724 }
  0x9a   : > { %v459_v42 = vrot.slane %v458_v40, 6  ;;  %v726_v56 = vrot.slane %v725_v41, 6 }
  0x9c   : > { %v461_v43 = vsel %vm460_vm2, %v459_v42, %v458_v40  ;;  %v728_v4 = vsel %vm727_vm6, %v726_v56, %v725_v41 }
  0x9d   : > { %v463_v44 = vmul.bf16 %v461_v43, %v1536_v29  ;;  %v555_v45 = vpop.permute.xlu0 %554  ;;  %v822_v46 = vpop.permute.xlu1 %821  ;;  %v730_v6 = vmul.bf16 %v728_v4, %v1536_v29  ;;  %v1341_v43 = vld [vmem:[%s1711_s0 + $0x10] sm:$0xff]   ;;  %v1346_v4 = vld [vmem:[%s1711_s0 + $0x38] sm:$0xff]  }
  0x9e   : > { %v556_v47 = vrot.slane %v555_v45, 6  ;;  %v823_v50 = vrot.slane %v822_v46, 6 }
  0x9f   : > { %v480_v48 = vrot.slane %v463_v44, %v1529_v22  ;;  %v473_v58 = vcombine.high %v463_v44, %v463_v44  ;;  %v747_v10 = vrot.slane %v730_v6, %v1529_v22  ;;  %v740_v13 = vcombine.high %v730_v6, %v730_v6 }
  0xa0   : > { %v558_v49 = vsel %vm557_vm3, %v556_v47, %v555_v45  ;;  %v825_v57 = vsel %vm824_vm4, %v823_v50, %v822_v46 }
  0xa1   : > { %v560_v51 = vmul.bf16 %v558_v49, %v1536_v29  ;;  %489 = vrot.lane.b32.xlu0 %v480_v48, %s1436_s29  ;;  %v992_v52 = vpop.permute.xlu0 %991  ;;  %v305_v53 = vpop.permute.xlu1 %304  ;;  %v827_v0 = vmul.bf16 %v825_v57, %v1536_v29  ;;  %v487_v5 = vrot.slane %v473_v58, %v1529_v22  ;;  %v488_v7 = vcombine.high %v480_v48, %v480_v48 }
  0xa2   : > { %v993_v11 = vrot.slane %v992_v52, 6  ;;  %v755_v16 = vcombine.high %v747_v10, %v747_v10  ;;  %v754_v18 = vrot.slane %v740_v13, %v1529_v22 }
  0xa3   : > { %v570_v54 = vcombine.high %v560_v51, %v560_v51  ;;  %v577_v55 = vrot.slane %v560_v51, %v1529_v22  ;;  %v844_v8 = vrot.slane %v827_v0, %v1529_v22  ;;  %v837_v9 = vcombine.high %v827_v0, %v827_v0 }
  0xa4   : > { %v995_v15 = vsel %vm994_vm7, %v993_v11, %v992_v52  ;;  %v1343_v52 = vld [vmem:[%s1711_s0 + $0x20] sm:$0xff]  }
  0xa5   : > { %586 = vrot.lane.b32.xlu1 %v577_v55, %s1437_s30  ;;  %v585_v59 = vcombine.high %v577_v55, %v577_v55  ;;  %v307_v60 = vpop.permute.xlu0 %306  ;;  %v309_v61 = vpop.permute.xlu1 %308  ;;  %v584_v1 = vrot.slane %v570_v54, %v1529_v22  ;;  %v851_v12 = vrot.slane %v837_v9, %v1529_v22  ;;  %v852_v14 = vcombine.high %v844_v8, %v844_v8 }
  0xa6   : > { %v312_v62 = vsel %vm310_vm5, %v307_v60, %v309_v61  ;;  %v311_v63 = vsel %vm310_vm5, %v305_v53, %v307_v60  ;;  %v997_v17 = vmul.bf16 %v995_v15, %v1536_v29  ;;  %v1344_v60 = vld [vmem:[%s1711_s0 + $0x28] sm:$0xff]  }
  0xa7   : > { %588 = vrot.lane.b32.xlu0 %v585_v59, %s1437_s30  ;;  %1217 = vmatprep.subr.msk.bf16.mxu0 %vm317_vm0, %v312_v62  ;;  %v319_v2 = vsel %vm317_vm0, %v311_v63, 0  ;;  %v1345_v63 = vld [vmem:[%s1711_s0 + $0x30] sm:$0xff]  }
  0xa8   : > { %339 = vmatpush1.bf16.msra.mxu0 %v319_v2  ;;  %v1014_v19 = vrot.slane %v997_v17, %v1529_v22  ;;  %v1007_v20 = vcombine.high %v997_v17, %v997_v17 }
  0xa9   : > { %590 = vrot.lane.b32.xlu1 %v584_v1, %s1437_s30  ;;  %v660_v26 = vpop.permute.xlu0 %659  ;;  %v662_v28 = vpop.permute.xlu1 %661 }
  0xaa   : > { %v1021_v21 = vrot.slane %v1007_v20, %v1529_v22  ;;  %v1022_v23 = vcombine.high %v1014_v19, %v1014_v19  ;;  %v666_v44 = vsel %vm665_vm10, %v660_v26, %v662_v28 }
  0xab   : > { %493 = vrot.lane.b32.xlu0 %v487_v5, %s1436_s29  ;;  %1218 = vmatmul.mubr.msk.bf16.vlgmr.msra.gmra.mxu0 %vm313_vm1, %v1339_v3  ;;  %v672_v47 = vsel %vm317_vm0, %v666_v44, 0 }
  0xac   : > { %539 = vmatprep.mubr.bf16.mxu0 %v1435_v39 }
  0xad   : > { %491 = vrot.lane.b32.xlu1 %v488_v7, %s1436_s29  ;;  %v664_v27 = vpop.permute.xlu0 %663  ;;  %s1262_s29 = sshll.u32 %s1416_s18, 9  ;;  %s1348_s18 = scalar_lea.vmem %s1656_s26, 512 }
  0xae   : > { %v667_v45 = vsel %vm665_vm10, %v662_v28, %v664_v27  ;;  %s1661_s6 = scalar_lea.hbm %s1715_s4, %s1262_s29  ;;  %p1349_p12 = scmp.ne.s32.totalorder %s1656_s26, %s1348_s18 }
  0xaf   : > { %853 = vrot.lane.b32.xlu0 %v844_v8, %s1438_s7 }
  0xb0   : > { %p1350_p13 = pnand %p1349_p12, %p1509_p4 }
  0xb1   : > { %756 = vrot.lane.b32.xlu1 %v747_v10, %s1439_s8  ;;  %v1347_v10 = vld [vmem:[%s1711_s0 + $0x40] sm:$0xff]  }
  0xb2   : > { %p1351_p0 = pneg %p1350_p13 }
  0xb3   : > { %857 = vrot.lane.b32.xlu0 %v851_v12, %s1438_s7 }
  0xb5   : > { %855 = vrot.lane.b32.xlu1 %v852_v14, %s1438_s7  ;;  %s1665_s7 = scalar_lea.sflag [#allocation3], %s212_s21 }
  0xb7   : > { %758 = vrot.lane.b32.xlu0 %v755_v16, %s1439_s8 }
  0xb9   : > { %760 = vrot.lane.b32.xlu1 %v754_v18, %s1439_s8  ;;  %s1442_s8 = smov [#allocation2]  }
  0xbb   : > { %928 = vrot.lane.b32.xlu0 %v1548_v32, %s1440_s9 }
  0xbd   : > { %926 = vrot.lane.b32.xlu1 %v1541_v30, %s1440_s9 }
  0xbf   : > { %1023 = vrot.lane.b32.xlu0 %v1014_v19, %s1441_s10 }
  0xc1   : > { %930 = vrot.lane.b32.xlu1 %v1551_v33, %s1440_s9  ;;  %s1352_s9 = sshll.u32 %s1442_s8, 4  ;;  %s1353_s9 = int_to_ptr.vmem [resolvable:$false] %s1352_s9 }
  0xc2   : > { %p1355_p1 = scmp.lt.s32.totalorder %s1656_s26, %s1353_s9 }
  0xc3   : > { %1027 = vrot.lane.b32.xlu0 %v1021_v21, %s1441_s10 }
  0xc5   : > { %1025 = vrot.lane.b32.xlu1 %v1022_v23, %s1441_s10  ;;  %s1354_s10 = scalar_lea.vmem %s1353_s9, 1024 }
  0xc6   : > { %p1356_p2 = scmp.lt.s32.totalorder %s1354_s10, %s1348_s18 }
  0xc7   : > { %1097 = vperm.xlu0 %1337, %v1089_v24  }
  0xc8   : > { %p1357_p3 = por %p1356_p2, %p1355_p1 }
  0xc9   : > { %1092 = vperm.xlu1 %1336, %v1088_v25  }
  0xca   : > { %p1358_p5 = pnand %p1357_p3, %p1351_p0 }
  0xf0   : > { %v424_v11 = vpop.f32.mrf.mxu1 }
 0x113   : > { %v490_v29 = vpop.permute.xlu0 %489 }
 0x117   : > { %v587_v30 = vpop.permute.xlu1 %586 }
 0x119   : > { %v589_v22 = vpop.permute.xlu0 %588 }
 0x11a   : > { %v593_v31 = vsel %vm592_vm8, %v587_v30, %v589_v22 }
 0x11b   : > { %v591_v32 = vpop.permute.xlu1 %590  ;;  %v599_v34 = vsel %vm317_vm0, %v593_v31, 0 }
 0x11c   : > { %v594_v33 = vsel %vm592_vm8, %v589_v22, %v591_v32 }
 0x11d   : > { %v494_v35 = vpop.permute.xlu0 %493  ;;  %1230 = vmatprep.subr.msk.bf16.mxu1 %vm317_vm0, %v594_v33 }
 0x11e   : > { %619 = vmatpush1.bf16.msra.mxu1 %v599_v34 }
 0x11f   : > { %v492_v37 = vpop.permute.xlu1 %491 }
 0x120   : > { %v496_v38 = vsel %vm495_vm9, %v490_v29, %v492_v37  ;;  %v497_v40 = vsel %vm495_vm9, %v492_v37, %v494_v35 }
 0x121   : > { %v502_v41 = vsel %vm317_vm0, %v496_v38, 0  ;;  %v854_v42 = vpop.permute.xlu0 %853  ;;  %1225 = vmatprep.subr.msk.bf16.mxu0 %vm317_vm0, %v497_v40  ;;  %1231 = vmatmul.mubr.msk.bf16.vlgmr.msra.gmra.mxu1 %vm313_vm1, %v1342_v36 }
 0x122   : > { %522 = vmatpush1.bf16.msra.mxu0 %v502_v41  ;;  %806 = vmatprep.mubr.bf16.mxu1 %v1435_v39 }
 0x123   : > { %1235 = vmatprep.subr.msk.bf16.mxu0 %vm317_vm0, %v667_v45  ;;  %v757_v46 = vpop.permute.xlu1 %756 }
 0x125   : > { %v858_v48 = vpop.permute.xlu0 %857  ;;  %1226 = vmatmul.mubr.msk.bf16.vlgmr.msra.gmra.mxu0 %vm313_vm1, %v1341_v43 }
 0x126   : > { %692 = vmatpush1.bf16.msra.mxu0 %v672_v47  ;;  %709 = vmatprep.mubr.bf16.mxu0 %v1435_v39 }
 0x127   : > { %v856_v49 = vpop.permute.xlu1 %855 }
 0x128   : > { %v861_v50 = vsel %vm859_vm11, %v856_v49, %v858_v48  ;;  %v860_v53 = vsel %vm859_vm11, %v854_v42, %v856_v49 }
 0x129   : > { %v759_v51 = vpop.permute.xlu0 %758  ;;  %1245 = vmatprep.subr.msk.bf16.mxu0 %vm317_vm0, %v861_v50  ;;  %v866_v57 = vsel %vm317_vm0, %v860_v53, 0 }
 0x12a   : > { %v763_v54 = vsel %vm762_vm12, %v757_v46, %v759_v51 }
 0x12b   : > { %v761_v55 = vpop.permute.xlu1 %760  ;;  %v769_v58 = vsel %vm317_vm0, %v763_v54, 0 }
 0x12c   : > { %v764_v56 = vsel %vm762_vm12, %v759_v51, %v761_v55 }
 0x12d   : > { %v929_v59 = vpop.permute.xlu0 %928  ;;  %1236 = vmatmul.mubr.msk.bf16.vlgmr.msra.gmra.mxu0 %vm313_vm1, %v1343_v52  ;;  %1240 = vmatprep.subr.msk.bf16.mxu1 %vm317_vm0, %v764_v56 }
 0x12e   : > { %886 = vmatpush1.bf16.msra.mxu0 %v866_v57  ;;  %789 = vmatpush1.bf16.msra.mxu1 %v769_v58 }
 0x12f   : > { %v927_v61 = vpop.permute.xlu1 %926  ;;  %903 = vmatprep.mubr.bf16.mxu0 %v1435_v39 }
 0x130   : > { %v933_v0 = vsel %vm932_vm13, %v927_v61, %v929_v59 }
 0x131   : > { %v1024_v62 = vpop.permute.xlu0 %1023  ;;  %1241 = vmatmul.mubr.msk.bf16.vlgmr.msra.gmra.mxu1 %vm313_vm1, %v1344_v60  ;;  %v939_v3 = vsel %vm317_vm0, %v933_v0, 0 }
 0x132   : > { %976 = vmatprep.mubr.bf16.mxu1 %v1435_v39 }
 0x133   : > { %v931_v1 = vpop.permute.xlu1 %930 }
 0x134   : > { %v934_v2 = vsel %vm932_vm13, %v929_v59, %v931_v1 }
 0x135   : > { %1246 = vmatmul.mubr.msk.bf16.vlgmr.msra.gmra.mxu0 %vm313_vm1, %v1345_v63  ;;  %1250 = vmatprep.subr.msk.bf16.mxu1 %vm317_vm0, %v934_v2  ;;  %v1028_v5 = vpop.permute.xlu0 %1027 }
 0x136   : > { %959 = vmatpush1.bf16.msra.mxu1 %v939_v3  ;;  %1073 = vmatprep.mubr.bf16.mxu0 %v1435_v39  ;;  %v426_v39 = vpop.f32.mrf.mxu1 }
 0x137   : > { %v1026_v6 = vpop.permute.xlu1 %1025 }
 0x138   : > { %v1030_v7 = vsel %vm1029_vm14, %v1024_v62, %v1026_v6  ;;  %v1031_v8 = vsel %vm1029_vm14, %v1026_v6, %v1028_v5  ;;  %v428_v14 = vpop.f32.mrf.mxu1 }
 0x139   : > { %v1036_v9 = vsel %vm317_vm0, %v1030_v7, 0  ;;  %1251 = vmatmul.mubr.msk.bf16.vlgmr.msra.gmra.mxu1 %vm313_vm1, %v1346_v4  ;;  %1255 = vmatprep.subr.msk.bf16.mxu0 %vm317_vm0, %v1031_v8 }
 0x13a   : > { %1056 = vmatpush1.bf16.msra.mxu0 %v1036_v9  ;;  %v430_v16 = vpop.f32.mrf.mxu1 }
 0x13d   : > { %1256 = vmatmul.mubr.msk.bf16.vlgmr.msra.gmra.mxu0 %vm313_vm1, %v1347_v10 }
 0x144   : > { %v1093_v63 = vpop.permute.xlu1 %1092 }
 0x16b   : > { %v358_v12 = vpop.f32.mrf.mxu0 }
 0x16c   : > { %v425_v27 = vadd.f32 %v424_v11, %v358_v12 }
 0x16d   : > { %v360_v13 = vpop.f32.mrf.mxu0 }
 0x16e   : > { %v427_v30 = vadd.f32 %v426_v39, %v360_v13  ;;  %v1098_v39 = vpop.permute.xlu0 %1097 }
 0x16f   : > { %v362_v15 = vpop.f32.mrf.mxu0 }
 0x170   : > { %v429_v33 = vadd.f32 %v428_v14, %v362_v15 }
 0x171   : > { %v364_v17 = vpop.f32.mrf.mxu0 }
 0x172   : > { %v431_v37 = vadd.f32 %v430_v16, %v364_v17 }
 0x1e1   : > { %v638_v18 = vpop.f32.mrf.mxu1 }
 0x1e3   : > { %v640_v21 = vpop.f32.mrf.mxu1 }
 0x1e5   : > { %v541_v19 = vpop.f32.mrf.mxu0  ;;  %v642_v25 = vpop.f32.mrf.mxu1 }
 0x1e6   : > { %v550_v22 = vadd.f32 %v541_v19, %v425_v27 }
 0x1e7   : > { %v543_v20 = vpop.f32.mrf.mxu0  ;;  %v644_v28 = vpop.f32.mrf.mxu1 }
 0x1e8   : > { %v551_v34 = vadd.f32 %v543_v20, %v427_v30  ;;  %v647_v38 = vadd.f32 %v638_v18, %v550_v22 }
 0x1e9   : > { %v545_v23 = vpop.f32.mrf.mxu0 }
 0x1ea   : > { %v552_v40 = vadd.f32 %v545_v23, %v429_v33  ;;  %v648_v43 = vadd.f32 %v640_v21, %v551_v34 }
 0x1eb   : > { %v547_v24 = vpop.f32.mrf.mxu0 }
 0x1ec   : > { %v553_v44 = vadd.f32 %v547_v24, %v431_v37  ;;  %v649_v48 = vadd.f32 %v642_v25, %v552_v40 }
 0x1ed   : > { %v711_v26 = vpop.f32.mrf.mxu0 }
 0x1ee   : > { %v720_v45 = vadd.f32 %v711_v26, %v647_v38  ;;  %v650_v53 = vadd.f32 %v644_v28, %v553_v44 }
 0x1ef   : > { %v713_v29 = vpop.f32.mrf.mxu0 }
 0x1f0   : > { %v721_v49 = vadd.f32 %v713_v29, %v648_v43 }
 0x1f1   : > { %v715_v31 = vpop.f32.mrf.mxu0  ;;  %v808_v32 = vpop.f32.mrf.mxu1 }
 0x1f2   : > { %v817_v50 = vadd.f32 %v808_v32, %v720_v45  ;;  %v722_v54 = vadd.f32 %v715_v31, %v649_v48 }
 0x1f3   : > { %v717_v35 = vpop.f32.mrf.mxu0  ;;  %v810_v36 = vpop.f32.mrf.mxu1 }
 0x1f4   : > { %v818_v55 = vadd.f32 %v810_v36, %v721_v49  ;;  %v723_v59 = vadd.f32 %v717_v35, %v650_v53 }
 0x1f5   : > { %v812_v41 = vpop.f32.mrf.mxu1  ;;  %v905_v42 = vpop.f32.mrf.mxu0 }
 0x1f6   : > { %v914_v56 = vadd.f32 %v905_v42, %v817_v50  ;;  %v819_v60 = vadd.f32 %v812_v41, %v722_v54 }
 0x1f7   : > { %v814_v46 = vpop.f32.mrf.mxu1  ;;  %v907_v47 = vpop.f32.mrf.mxu0 }
 0x1f8   : > { %v915_v61 = vadd.f32 %v907_v47, %v818_v55  ;;  %v820_v2 = vadd.f32 %v814_v46, %v723_v59 }
 0x1f9   : > { %v909_v51 = vpop.f32.mrf.mxu0  ;;  %v978_v52 = vpop.f32.mrf.mxu1 }
 0x1fa   : > { %v987_v62 = vadd.f32 %v978_v52, %v914_v56  ;;  %v916_v3 = vadd.f32 %v909_v51, %v819_v60 }
 0x1fb   : > { %v911_v57 = vpop.f32.mrf.mxu0  ;;  %v980_v58 = vpop.f32.mrf.mxu1 }
 0x1fc   : > { %v988_v4 = vadd.f32 %v980_v58, %v915_v61  ;;  %v917_v8 = vadd.f32 %v911_v57, %v820_v2 }
 0x1fd   : > { %v982_v0 = vpop.f32.mrf.mxu1  ;;  %v1075_v1 = vpop.f32.mrf.mxu0 }
 0x1fe   : > { %v1084_v5 = vadd.f32 %v1075_v1, %v987_v62  ;;  %v989_v9 = vadd.f32 %v982_v0, %v916_v3 }
 0x1ff   : > { %v1077_v6 = vpop.f32.mrf.mxu0  ;;  %v984_v7 = vpop.f32.mrf.mxu1 }
 0x200   : > { %v1085_v10 = vadd.f32 %v1077_v6, %v988_v4  ;;  %v1100_v11 = vadd.f32 %v1093_v63, %v1084_v5  ;;  %v990_v14 = vadd.f32 %v984_v7, %v917_v8 }
 0x201   : > { %v1079_v12 = vpop.f32.mrf.mxu0 }
 0x202   : > { %v1101_v13 = vadd.f32 %v1093_v63, %v1085_v10  ;;  %1104 = vst [vmem:[%s214_s24] sm:$0xff] %v1100_v11  ;;  %v1086_v15 = vadd.f32 %v1079_v12, %v989_v9 }
 0x203   : > { %v1081_v16 = vpop.f32.mrf.mxu0 }
 0x204   : > { %1105 = vst [vmem:[%s214_s24 + $0x8] sm:$0xff] %v1101_v13  ;;  %v1102_v17 = vadd.f32 %v1098_v39, %v1086_v15  ;;  %v1087_v18 = vadd.f32 %v1081_v16, %v990_v14 }
 0x206   : > { %1106 = vst [vmem:[%s214_s24 + $0x10] sm:$0xff] %v1102_v17  ;;  %v1103_v19 = vadd.f32 %v1098_v39, %v1087_v18 }
 0x208   : > { %1107 = vst [vmem:[%s214_s24 + $0x18] sm:$0xff] %v1103_v19 }
 0x209   : > { %1361 = shalt.err (!%p1358_p5)
}
 0x20a   : > { %s1362_s11 = scalar_lea.hbm %s1661_s6, 512  ;;  %s1366_s21 = scalar_lea.hbm %s1715_s4, 1024 }
 0x20b   : > { %p1363_p6 = scmp.ne.s32.totalorder %s1661_s6, %s1362_s11  ;;  %p1367_p10 = scmp.lt.s32.totalorder %s1661_s6, %s1715_s4 }
 0x20c   : > { %p1368_p11 = scmp.lt.s32.totalorder %s1366_s21, %s1362_s11 }
 0x20d   : > { %p1364_p7 = pnand %p1363_p6, %p1509_p4 }
 0x20e   : > { %p1369_p12 = por %p1368_p11, %p1367_p10 }
 0x20f   : > { %p1365_p9 = pneg %p1364_p7 }
 0x211   : > { %p1370_p13 = pnand %p1369_p12, %p1365_p9 }
 0x213   : > { %1373 = shalt.err (!%p1370_p13)
}
 0x214   : > { %s1443_s29 = smov 256  }
 0x215   : > { %1264 = dma.vmem_to_hbm [thread:$0]  (%p1509_p4), %s1656_s26, 512, %s1661_s6, %s1665_s7, %s1443_s29, %s1443_s29, %s1430_s12  }
 0x216 PF: > { %p1270_p0 = scmp.ge.s32.totalorder %s1424_s20, 2  ;;  %s1139_s30 = sand.u32 1, %s1404_s15  }
 0x217   : > { %s1140_s5 = scalar_lea.sflag [#allocation3], %s1139_s30 }
 0x218   : > { %p1267_p1 = pnand %p1270_p0, %p1516_p8 }
 0x21a   : > { %p1268_p2 = pneg %p1267_p1 }
 0x21c   : > { %1399 = dma.done.wait (%p1268_p2), %s1140_s5, 512  }
 0x21d   : > { %1401 = vsyncadd (%p1268_p2), %s1140_s5, 4294966784  ;;  %s17_s20 = sadd.s32 1, %s1424_s20   ;;  %s1718_s15 = smov %s1408_s16 }
 0x21e   : > { %p14_p3 = scmp.ge.s32.totalorder %s17_s20, 4   ;;  %s1719_s16 = smov %s1412_s17 }
 0x21f   : > { %s1720_s17 = smov %s1522_s28  ;;  %s1721_s18 = smov %s1420_s19 }
 0x220   : > { %s1722_s19 = smov %s1724_s23  ;;  %16 = sbr.rel (!%p14_p3) target bundleno = 4 (0x4), region = 79 }
 0x225   :  { %1145 = vsyncpa [#allocation3], 1 }
 0x226   :  { %1147 = vsyncpa [#allocation3 + $0x1], 1 }

</bundles_post_ra>
